<compile_context>
chip_gen: v7x
topology: tpu7x:2x2x1
jax: 0.10.0
libtpu: 0.0.40
codegen_flags: <defaults>
</compile_context>

<pallas_src>
import jax
import jax.numpy as jnp
from jax import lax
from jax.experimental import pallas as pl
from jax.experimental.pallas import tpu as pltpu


def _first_argmax(x, iota, c):
    """Index of the first maximum along the last axis, keepdims=True."""
    m = jnp.max(x, axis=-1, keepdims=True)
    return jnp.min(jnp.where(x == m, iota, c), axis=-1, keepdims=True)


def _eval_kernel(x_ref, tok_ref):
    # eval path: _, tokens = embedding.max(dim=-1)
    x = x_ref[...].astype(jnp.float32)
    n, c = x.shape
    iota = lax.broadcasted_iota(jnp.int32, (n, c), 1)
    tok_ref[...] = _first_argmax(x, iota, c).astype(jnp.int32)


def _train_kernel(x_ref, g_ref, tok_ref, logp_ref):
    # train path: probs = softmax(embedding, -1); sample one class per row.
    x = x_ref[...].astype(jnp.float32)
    g = g_ref[...].astype(jnp.float32)
    n, c = x.shape

    # Single iota reused for both the argmax tie-break and the one-hot gather.
    iota = lax.broadcasted_iota(jnp.int32, (n, c), 1)

    # Gumbel-max sampling: argmax(logits + G), G ~ Gumbel(0,1) -- identical in
    # distribution to sampling from softmax(logits).
    tok = _first_argmax(x + g, iota, c)

    # log-prob of the sampled token (stored in the trajectory for REINFORCE).
    x_max = jnp.max(x, axis=-1, keepdims=True)
    lse = jnp.log(jnp.sum(jnp.exp(x - x_max), axis=-1, keepdims=True)) + x_max
    x_tok = jnp.sum(jnp.where(iota == tok, x, 0.0), axis=-1, keepdims=True)

    tok_ref[...] = tok.astype(jnp.int32)
    logp_ref[...] = (x_tok - lse).astype(jnp.float32)


def _pick_block_n(n: int, c: int) -> int:
    """Row-tile size: ~2 MiB per (block_n, C) f32 buffer so that two inputs,
    double-buffered, stay far below the scoped VMEM limit on every TPU
    generation (including v7x's 64 MiB physical VMEM)."""
    if n <= 8:
        return n  # full dim is always a legal block extent
    rows = (2 * 1024 * 1024) // max(1, c * 4)
    rows = max(8, min(rows, 1024, n))
    return (rows // 8) * 8  # keep the sublane dim a multiple of 8


def stochastic_classifier_forward(embedding, *, training: bool, seed: int = 0):
    """Pallas port of StochasticClassifier.forward.

    Returns (tokens, trajectory). trajectory is None in eval mode; in training
    mode it is a dict {"actions", "log_probs"}.  NOTE: callers must vary `seed`
    per training step, otherwise the categorical samples repeat across steps.
    """
    assert embedding.ndim == 2
    n, c = embedding.shape
    block_n = _pick_block_n(n, c)
    grid = (pl.cdiv(n, block_n),)

    x_spec = pl.BlockSpec((block_n, c), lambda i: (i, 0))
    col_spec = pl.BlockSpec((block_n, 1), lambda i: (i, 0))
    compiler_params = pltpu.CompilerParams(
        dimension_semantics=("parallel",),      # v7x: shard row tiles over both TCs
        vmem_limit_bytes=32 * 1024 * 1024,
    )
    in_bytes = n * c * embedding.dtype.itemsize

    if not training:
        tok = pl.pallas_call(
            _eval_kernel,
            grid=grid,
            in_specs=[x_spec],
            out_specs=col_spec,
            out_shape=jax.ShapeDtypeStruct((n, 1), jnp.int32),
            compiler_params=compiler_params,
            cost_estimate=pl.CostEstimate(
                flops=2 * n * c, transcendentals=0,
                bytes_accessed=in_bytes + n * 4),
        )(embedding)
        return tok[:, 0], None

    # Host-side Gumbel(0,1) noise streamed into the kernel alongside the logits.
    gumbel = jax.random.gumbel(jax.random.PRNGKey(seed), (n, c), dtype=jnp.float32)

    g_spec = pl.BlockSpec((block_n, c), lambda i: (i, 0))
    tok, logp = pl.pallas_call(
        _train_kernel,
        grid=grid,
        in_specs=[x_spec, g_spec],
        out_specs=(col_spec, col_spec),
        out_shape=(
            jax.ShapeDtypeStruct((n, 1), jnp.int32),
            jax.ShapeDtypeStruct((n, 1), jnp.float32),
        ),
        compiler_params=compiler_params,
        cost_estimate=pl.CostEstimate(
            flops=8 * n * c, transcendentals=n * c + n,
            bytes_accessed=in_bytes + n * c * 4 + n * 8),
    )(embedding, gumbel)

    trajectory = {"actions": tok[:, 0], "log_probs": logp[:, 0]}
    return tok[:, 0], trajectory


if __name__ == "__main__":
    key = jax.random.PRNGKey(0)
    N, C = 8, 16  # small [N, C] class-logit matrix
    embedding = jax.random.normal(key, (N, C), dtype=jnp.float32)

    # eval path (argmax)
    tokens_eval, traj_eval = stochastic_classifier_forward(embedding, training=False)
    tokens_eval = jax.block_until_ready(tokens_eval)
    assert traj_eval is None
    ref_argmax = jnp.argmax(embedding, axis=-1).astype(jnp.int32)
    assert bool(jnp.all(tokens_eval == ref_argmax)), "eval argmax mismatch"

    # eval path also accepts bf16 logits (halves HBM traffic on the hot path)
    emb_bf16 = embedding.astype(jnp.bfloat16)
    tokens_bf16, _ = stochastic_classifier_forward(emb_bf16, training=False)
    tokens_bf16 = jax.block_until_ready(tokens_bf16)
    ref_bf16 = jnp.argmax(emb_bf16, axis=-1).astype(jnp.int32)
    assert bool(jnp.all(tokens_bf16 == ref_bf16)), "bf16 eval argmax mismatch"

    # training path (categorical sample + log-probs)
    tokens_train, traj = stochastic_classifier_forward(embedding, training=True, seed=1234)
    tokens_train = jax.block_until_ready(tokens_train)
    logp = jax.block_until_ready(traj["log_probs"])
    assert tokens_train.shape == (N,) and logp.shape == (N,)
    assert bool(jnp.all((tokens_train >= 0) & (tokens_train < C)))
    # sampled log-probs must match log_softmax(embedding) gathered at the tokens
    ref_logp = jax.nn.log_softmax(embedding, axis=-1)[jnp.arange(N), tokens_train]
    assert bool(jnp.allclose(logp, ref_logp, atol=1e-5)), "log-prob mismatch"

    print("KERNEL_OK")
</pallas_src>

<mosaic_0001>
module attributes {stable_mosaic.version = 11 : i64} {
  func.func @_eval_kernel(%arg0: i32, %arg1: memref<8x16xf32, #tpu.memory_space<vmem>>, %arg2: memref<8x1xi32, #tpu.memory_space<vmem>>) attributes {dimension_semantics = [#tpu.dimension_semantics<parallel>], iteration_bounds = array<i64: 1>, scalar_prefetch = 0 : i64, scratch_operands = 0 : i64, tpu.core_type = #tpu.core_type<tc>, window_params = [{transform_indices = @transform_0, window_bounds = array<i64: 8, 16>}, {transform_indices = @transform_1, window_bounds = array<i64: 8, 1>}]} {
    %c0 = arith.constant 0 : index
    %c0_0 = arith.constant 0 : index
    %0 = vector.load %arg1[%c0, %c0_0] : memref<8x16xf32, #tpu.memory_space<vmem>>, vector<8x16xf32>
    %1 = tpu.iota {dimensions = array<i32: 1>} : vector<8x16xi32>
    %cst = arith.constant dense<0xFF800000> : vector<8xf32>
    %2 = vector.multi_reduction <maximumf>, %0, %cst [1] : vector<8x16xf32> to vector<8xf32>
    %3 = vector.shape_cast %2 : vector<8xf32> to vector<8x1xf32>
    %4 = vector.broadcast %3 : vector<8x1xf32> to vector<8x16xf32>
    %5 = arith.cmpf oeq, %0, %4 : vector<8x16xf32>
    %c16_i32 = arith.constant 16 : i32
    %6 = vector.broadcast %c16_i32 : i32 to vector<8x16xi32>
    %7 = arith.select %5, %1, %6 : vector<8x16xi1>, vector<8x16xi32>
    %cst_1 = arith.constant dense<2147483647> : vector<8xi32>
    %8 = vector.multi_reduction <minsi>, %7, %cst_1 [1] : vector<8x16xi32> to vector<8xi32>
    %9 = vector.shape_cast %8 : vector<8xi32> to vector<8x1xi32>
    %c0_2 = arith.constant 0 : index
    %c0_3 = arith.constant 0 : index
    %10 = vector.load %arg2[%c0_2, %c0_3] : memref<8x1xi32, #tpu.memory_space<vmem>>, vector<8x1xi32>
    tpu.vector_store %arg2[%c0_2, %c0_3], %9 {strides = array<i32>} : memref<8x1xi32, #tpu.memory_space<vmem>>, vector<8x1xi32>,
    return
  }
  func.func @transform_0(%arg0: i32) -> (i32, i32) {
    %c0_i32 = arith.constant 0 : i32
    %c0_i32_0 = arith.constant 0 : i32
    return %arg0, %c0_i32 : i32, i32
  }
  func.func @transform_1(%arg0: i32) -> (i32, i32) {
    %c0_i32 = arith.constant 0 : i32
    %c0_i32_0 = arith.constant 0 : i32
    return %arg0, %c0_i32 : i32, i32
  }
}

</mosaic_0001>

<bundles_post_ra>
// kernel: tpu_custom_call.1
= control target key start
LH: loop header
LB: loop body
LE: loop exit
PB: predicated region body
PF: predicated region fallthrough
CT: control target
= control target key end

     0   :  { %6 = vsyncpa [#allocation3], 0  ;;  %s76_s6 = smov [#allocation2]   ;;  %s102_s0 = inlined_call_operand.hbm [shape: f32[8,16], index: 0, kind: input, shape index: {}]   ;;  %s103_s1 = inlined_call_operand.vmem [shape: s32[8,1], index: 1, kind: output, shape index: {}]  }
   0x1   :  { %s13_s7 = sshll.u32 %s76_s6, 4  ;;  %s52_s10 = scalar_lea.hbm %s102_s0, 128  ;;  %s14_s7 = int_to_ptr.vmem [resolvable:$true] %s13_s7 }
   0x2   :  { %p53_p0 = scmp.ne.s32.totalorder %s102_s0, %s52_s10  ;;  %p56_p1 = scmp.lt.u32.totalorder %s52_s10, %s102_s0 }
   0x4   :  { %p58_p2 = pnand %p56_p1, %p53_p0 }
   0x6   :  { %61 = shalt.err (!%p58_p2)
}
   0x7   :  { %s62_s15 = scalar_lea.vmem %s14_s7, 128  ;;  %p67_p4 = scmp.lt.s32.totalorder %s14_s7, %s14_s7 }
   0x8   :  { %p63_p3 = scmp.ne.s32.totalorder %s14_s7, %s62_s15  ;;  %p68_p5 = scmp.lt.s32.totalorder %s62_s15, %s62_s15 }
   0xa   :  { %p69_p6 = por %p68_p5, %p67_p4 }
   0xc   :  { %p70_p7 = pnand %p69_p6, %p63_p3 }
   0xe   :  { %73 = shalt.err (!%p70_p7)
}
   0xf   :  { %16 = dma.hbm_to_vmem [thread:$0]  %s102_s0, 128, %s14_s7, [#allocation3]  }
  0x10   :  { %74 = dma.done.wait [#allocation3], 128  }
  0x11   :  { %75 = vsyncadd [#allocation3], 4294967168  ;;  %vm23_vm0 = vcmask 130048   ;;  %v20_v0 = vld [vmem:[#allocation2] sm:$0xff]  ;;  %v21_v2 = vlaneseq  ;;  %vm44_vm3 = vcmask 7168  }
  0x12   :  { %v24_v1 = vsel %vm23_vm0, %v20_v0, -inf }
  0x13   :  { %25 = vmax.xlane.f32.xlu0 %v24_v1  ;;  %v22_v3 = vand.u32 127, %v21_v2 }
  0xa0   :  { %v26_v4 = vpop.xlane.xlu0 %25 }
  0xa1   :  { %vm27_vm1 = vcmp.eq.f32.partialorder %v20_v0, %v26_v4 }
  0xa2   :  { %v28_v5 = vsel %vm27_vm1, %v22_v3, 16 }
  0xa3   :  { %v29_v6 = vsel %vm23_vm0, %v28_v5, 2147483647 }
  0xa4   :  { %v31_v7 = vshra.s32 %v29_v6, 16  ;;  %v30_v9 = vand.u32 65535, %v29_v6 }
  0xa6   :  { %v33_v8 = vcvt.s32.f32 %v31_v7  ;;  %v32_v11 = vcvt.s32.f32 %v30_v9 }
  0xa8   :  { %34 = vmin.xlane.f32.xlu0 %v33_v8 }
 0x135   :  { %v35_v10 = vpop.xlane.xlu0 %34 }
 0x136   :  { %vm36_vm2 = vcmp.eq.f32.partialorder %v33_v8, %v35_v10  ;;  %v41_v13 = vcvt.f32.s32 %v35_v10 }
 0x137   :  { %v37_v12 = vsel %vm36_vm2, %v32_v11, inf }
 0x138   :  { %38 = vmin.xlane.f32.xlu1 %v37_v12  ;;  %v42_v15 = vshll.u32 %v41_v13, 16 }
 0x1c5   :  { %v39_v14 = vpop.xlane.xlu1 %38 }
 0x1c6   :  { %v40_v16 = vcvt.f32.s32 %v39_v14 }
 0x1c8   :  { %v43_v17 = vadd.s32 %v42_v15, %v40_v16 }
 0x1ca   :  { %45 = vst.msk [vmem:[%s103_s1] sm:$0xff] %vm44_vm3, %v43_v17 }
 0x1cb   :  { %50 = vsyncpa [#allocation3], 1 }

</bundles_post_ra>
